<compile_context>
chip_gen: v5e
topology: v5e:2x2
jax: 0.10.0
libtpu: 0.0.40
codegen_flags: <defaults>
</compile_context>

<pallas_src>
import functools
import random

import jax
import jax.numpy as jnp
from jax.experimental import pallas as pl
from jax.experimental.pallas import tpu as pltpu

LANE = 128


def _round_up(v, m):
    return -(-v // m) * m


# ----------------------------------------------------------------------------
# Kernel
# ----------------------------------------------------------------------------
def _dynamicnet_kernel(*refs, n_middle):
    """Fused forward: input linear -> n_middle * relu(middle linear) -> output linear.

    Ref layout (n_middle > 0):
        x, w_in, b_in, w_mid, b_mid, w_out, b_out, out
    Ref layout (n_middle == 0):
        x, w_in, b_in, w_out, b_out, out
    """
    if n_middle > 0:
        (x_ref, w_in_ref, b_in_ref, w_mid_ref, b_mid_ref,
         w_out_ref, b_out_ref, o_ref) = refs
    else:
        x_ref, w_in_ref, b_in_ref, w_out_ref, b_out_ref, o_ref = refs

    # input_linear: bf16 operands, f32 accumulation on the MXU.  Only cast
    # when x arrives as f32 (bf16 inputs are consumed directly).
    x = x_ref[...]
    if x.dtype != jnp.bfloat16:
        x = x.astype(jnp.bfloat16)
    h = jnp.dot(x, w_in_ref[...],
                preferred_element_type=jnp.float32) + b_in_ref[...]   # (tile_n, H_pad) f32

    # Weight-shared middle layer, applied n_middle times (unrolled at trace time).
    if n_middle > 0:
        w_mid = w_mid_ref[...]                                   # (H_pad, H_pad) bf16, loaded once
        b_mid = pl.broadcast_to(b_mid_ref[...], h.shape)         # hoisted broadcast
        for _ in range(n_middle):
            h = jnp.dot(h.astype(jnp.bfloat16), w_mid,
                        preferred_element_type=jnp.float32) + b_mid
            h = jnp.maximum(h, 0.0)

    # output_linear, written at the true D_out width (no padded writeback,
    # no post-kernel slice).
    y = jnp.dot(h.astype(jnp.bfloat16), w_out_ref[...],
                preferred_element_type=jnp.float32) + b_out_ref[...]
    o_ref[...] = y.astype(o_ref.dtype)


# ----------------------------------------------------------------------------
# One-time parameter preparation
# ----------------------------------------------------------------------------
def prepare_params(params):
    """Transpose to (in, out), cast weights to bf16, zero-pad the hidden width
    to a multiple of 128 lanes (mathematically exact: padded lanes stay 0
    through bias, ReLU and the zero-padded weight rows), biases as (1, out) f32."""
    H, D_in = params["w_in"].shape          # torch Linear stores (out, in)
    D_out = params["w_out"].shape[0]
    h_pad = _round_up(H, LANE)

    w_in = jnp.zeros((D_in, h_pad), jnp.bfloat16)
    w_in = w_in.at[:, :H].set(params["w_in"].T.astype(jnp.bfloat16))
    b_in = jnp.zeros((1, h_pad), jnp.float32)
    b_in = b_in.at[:, :H].set(params["b_in"].reshape(1, -1).astype(jnp.float32))

    w_mid = jnp.zeros((h_pad, h_pad), jnp.bfloat16)
    w_mid = w_mid.at[:H, :H].set(params["w_mid"].T.astype(jnp.bfloat16))
    b_mid = jnp.zeros((1, h_pad), jnp.float32)
    b_mid = b_mid.at[:, :H].set(params["b_mid"].reshape(1, -1).astype(jnp.float32))

    w_out = jnp.zeros((h_pad, D_out), jnp.bfloat16)
    w_out = w_out.at[:H, :].set(params["w_out"].T.astype(jnp.bfloat16))
    b_out = params["b_out"].reshape(1, -1).astype(jnp.float32)

    return dict(w_in=w_in, b_in=b_in, w_mid=w_mid, b_mid=b_mid,
                w_out=w_out, b_out=b_out)


# ----------------------------------------------------------------------------
# Tiling policy
# ----------------------------------------------------------------------------
def _choose_tiling(n, d_in, x_itemsize):
    """Return (tile_n, padded_N).

    * Tiles in the 512-1024 row sweet spot (measured ~85-86% of HBM roofline),
      realized with cdiv + row padding so any N works (no divisor search).
    * For N >= 256, at least 2 grid steps so v7x megacore can shard the batch.
    * Double-buffered x tile kept under ~8 MiB so the working set fits v5e's
      16 MiB default scoped VMEM without vmem_limit_bytes tweaks.
    """
    max_tile = 1024
    x_budget = 8 * 1024 * 1024
    while max_tile > 128 and 2 * max_tile * d_in * x_itemsize > x_budget:
        max_tile //= 2

    n8 = _round_up(n, 8)
    if n8 < 256:
        return n8, n8                                  # whole (8-padded) batch, one step
    steps = max(2, -(-n8 // max_tile))                 # >= 2 so both v7x TCs get work
    tile = _round_up(-(-n8 // steps), 8)
    return tile, steps * tile


# ----------------------------------------------------------------------------
# Forward wrapper
# ----------------------------------------------------------------------------
@functools.partial(jax.jit, static_argnames=("n_middle",))
def dynamicnet_forward(x, prepped, *, n_middle):
    """x: (N, D_in) float32 or bfloat16. prepped: output of prepare_params.
    n_middle: Python int (trace-time constant, like the module's randint)."""
    N, D_in = x.shape
    h_pad = prepped["w_in"].shape[1]
    d_out = prepped["w_out"].shape[1]

    tile_n, n_pad = _choose_tiling(N, D_in, x.dtype.itemsize)
    if n_pad != N:
        x = jnp.pad(x, ((0, n_pad - N), (0, 0)))       # only for awkward N; no-op otherwise
    grid = (n_pad // tile_n,)

    def const(shape):
        # Full array, VMEM-resident across all grid steps (constant index_map).
        return pl.BlockSpec(shape, lambda i: (0, 0))

    in_specs = [
        pl.BlockSpec((tile_n, D_in), lambda i: (i, 0)),   # x, tiled over batch
        const((D_in, h_pad)),                             # w_in
        const((1, h_pad)),                                # b_in
    ]
    args = [x, prepped["w_in"], prepped["b_in"]]
    if n_middle > 0:                                      # skip dead w_mid/b_mid DMA
        in_specs += [const((h_pad, h_pad)), const((1, h_pad))]
        args += [prepped["w_mid"], prepped["b_mid"]]
    in_specs += [const((h_pad, d_out)), const((1, d_out))]
    args += [prepped["w_out"], prepped["b_out"]]

    out = pl.pallas_call(
        functools.partial(_dynamicnet_kernel, n_middle=n_middle),
        out_shape=jax.ShapeDtypeStruct((n_pad, d_out), jnp.float32),
        grid=grid,
        in_specs=in_specs,
        out_specs=pl.BlockSpec((tile_n, d_out), lambda i: (i, 0)),
        compiler_params=pltpu.CompilerParams(
            dimension_semantics=("parallel",)),
    )(*args)

    return out[:N] if n_pad != N else out


# ----------------------------------------------------------------------------
# References & demo
# ----------------------------------------------------------------------------
def _init_linear(key, fan_in, fan_out):
    """Deterministic init mimicking torch.nn.Linear default (uniform +-1/sqrt(fan_in))."""
    kw, kb = jax.random.split(key)
    bound = 1.0 / jnp.sqrt(jnp.float32(fan_in))
    w = jax.random.uniform(kw, (fan_out, fan_in), jnp.float32, -bound, bound)
    b = jax.random.uniform(kb, (fan_out,), jnp.float32, -bound, bound)
    return w, b


def _reference_forward_f32(x, params, n_middle):
    """Pure f32 reference (PyTorch semantics)."""
    h = x @ params["w_in"].T + params["b_in"]
    for _ in range(n_middle):
        h = jnp.maximum(h @ params["w_mid"].T + params["b_mid"], 0.0)
    return h @ params["w_out"].T + params["b_out"]


def _reference_forward_bf16(x, params, n_middle):
    """Reference with the same bf16-operand / f32-accumulate scheme as the kernel."""
    bf = jnp.bfloat16
    h = jnp.dot(x.astype(bf), params["w_in"].T.astype(bf),
                preferred_element_type=jnp.float32) + params["b_in"]
    for _ in range(n_middle):
        h = jnp.dot(h.astype(bf), params["w_mid"].T.astype(bf),
                    preferred_element_type=jnp.float32) + params["b_mid"]
        h = jnp.maximum(h, 0.0)
    return jnp.dot(h.astype(bf), params["w_out"].T.astype(bf),
                   preferred_element_type=jnp.float32) + params["b_out"]


if __name__ == "__main__":
    # Shapes from the original module: (N, D_in) -> (N, D_out).
    N, D_in, H, D_out = 64, 1000, 100, 10

    key = jax.random.PRNGKey(0)
    kx, k1, k2, k3 = jax.random.split(key, 4)

    x = jax.random.normal(kx, (N, D_in), jnp.float32)

    w_in, b_in = _init_linear(k1, D_in, H)
    w_mid, b_mid = _init_linear(k2, H, H)
    w_out, b_out = _init_linear(k3, H, D_out)
    params = dict(w_in=w_in, b_in=b_in, w_mid=w_mid, b_mid=b_mid,
                  w_out=w_out, b_out=b_out)

    # One-time parameter prep (transpose / cast / pad) hoisted out of the forward path.
    prepped = prepare_params(params)

    # Check every possible loop count the module can draw (0..3); each is a
    # separately specialized (unrolled) kernel, including the n_middle==0
    # variant that skips the middle-layer DMA entirely.
    for n_middle in range(4):
        y = dynamicnet_forward(x, prepped, n_middle=n_middle)
        y = jax.block_until_ready(y)
        assert y.shape == (N, D_out)
        y_ref_bf16 = _reference_forward_bf16(x, params, n_middle)
        y_ref_f32 = _reference_forward_f32(x, params, n_middle)
        # Tight check vs a reference using the same bf16-operand / f32-accum scheme.
        assert jnp.allclose(y, y_ref_bf16, atol=2e-3, rtol=2e-3), \
            f"mismatch vs bf16 reference (n_middle={n_middle})"
        # Loose sanity check vs the pure-f32 PyTorch-semantics reference
        # (bf16 weights are an intentional accuracy trade).
        assert jnp.allclose(y, y_ref_f32, atol=5e-2, rtol=5e-2), \
            f"mismatch vs f32 reference (n_middle={n_middle})"

    # Dynamic control flow, exactly like the PyTorch module: the number of
    # shared middle layers is drawn eagerly in Python before the forward call.
    random.seed(0)
    n_middle = random.randint(0, 3)
    y = jax.block_until_ready(dynamicnet_forward(x, prepped, n_middle=n_middle))
    assert y.shape == (N, D_out)

    print("KERNEL_OK")
</pallas_src>

<mosaic_0001>
module attributes {stable_mosaic.version = 11 : i64} {
  func.func @_dynamicnet_kernel(%arg0: i32, %arg1: memref<64x1000xf32, #tpu.memory_space<vmem>>, %arg2: memref<1000x128xbf16, #tpu.memory_space<vmem>>, %arg3: memref<1x128xf32, #tpu.memory_space<vmem>>, %arg4: memref<128x10xbf16, #tpu.memory_space<vmem>>, %arg5: memref<1x10xf32, #tpu.memory_space<vmem>>, %arg6: memref<64x10xf32, #tpu.memory_space<vmem>>) attributes {dimension_semantics = [#tpu.dimension_semantics<parallel>], iteration_bounds = array<i64: 1>, scalar_prefetch = 0 : i64, scratch_operands = 0 : i64, tpu.core_type = #tpu.core_type<tc>, window_params = [{transform_indices = @transform_0, window_bounds = array<i64: 64, 1000>}, {pipeline_mode = #tpu.pipeline_mode<synchronous>, transform_indices = @transform_1, window_bounds = array<i64: 1000, 128>}, {pipeline_mode = #tpu.pipeline_mode<synchronous>, transform_indices = @transform_2, window_bounds = array<i64: 1, 128>}, {pipeline_mode = #tpu.pipeline_mode<synchronous>, transform_indices = @transform_3, window_bounds = array<i64: 128, 10>}, {pipeline_mode = #tpu.pipeline_mode<synchronous>, transform_indices = @transform_4, window_bounds = array<i64: 1, 10>}, {transform_indices = @transform_5, window_bounds = array<i64: 64, 10>}]} {
    %c0 = arith.constant 0 : index
    %c0_0 = arith.constant 0 : index
    %0 = vector.load %arg1[%c0, %c0_0] : memref<64x1000xf32, #tpu.memory_space<vmem>>, vector<64x1000xf32>
    %1 = arith.truncf %0 : vector<64x1000xf32> to vector<64x1000xbf16>
    %c0_1 = arith.constant 0 : index
    %c0_2 = arith.constant 0 : index
    %2 = vector.load %arg2[%c0_1, %c0_2] : memref<1000x128xbf16, #tpu.memory_space<vmem>>, vector<1000x128xbf16>
    %cst = arith.constant dense<0.000000e+00> : vector<64x128xf32>
    %3 = tpu.matmul %1, %2, %cst {dimension_numbers = #tpu.dot_dimension_numbers<[1], [0], [0], [1], [0, 0, 1, 1], [], []>} : vector<64x1000xbf16>, vector<1000x128xbf16>, vector<64x128xf32> -> vector<64x128xf32>
    %c0_3 = arith.constant 0 : index
    %c0_4 = arith.constant 0 : index
    %4 = vector.load %arg3[%c0_3, %c0_4] : memref<1x128xf32, #tpu.memory_space<vmem>>, vector<1x128xf32>
    %5 = vector.broadcast %4 : vector<1x128xf32> to vector<64x128xf32>
    %6 = arith.addf %3, %5 : vector<64x128xf32>
    %7 = arith.truncf %6 : vector<64x128xf32> to vector<64x128xbf16>
    %c0_5 = arith.constant 0 : index
    %c0_6 = arith.constant 0 : index
    %8 = vector.load %arg4[%c0_5, %c0_6] : memref<128x10xbf16, #tpu.memory_space<vmem>>, vector<128x10xbf16>
    %cst_7 = arith.constant dense<0.000000e+00> : vector<64x10xf32>
    %9 = tpu.matmul %7, %8, %cst_7 {dimension_numbers = #tpu.dot_dimension_numbers<[1], [0], [0], [1], [0, 0, 1, 1], [], []>} : vector<64x128xbf16>, vector<128x10xbf16>, vector<64x10xf32> -> vector<64x10xf32>
    %c0_8 = arith.constant 0 : index
    %c0_9 = arith.constant 0 : index
    %10 = vector.load %arg5[%c0_8, %c0_9] : memref<1x10xf32, #tpu.memory_space<vmem>>, vector<1x10xf32>
    %11 = vector.broadcast %10 : vector<1x10xf32> to vector<64x10xf32>
    %12 = arith.addf %9, %11 : vector<64x10xf32>
    %c0_10 = arith.constant 0 : index
    %c0_11 = arith.constant 0 : index
    %13 = vector.load %arg6[%c0_10, %c0_11] : memref<64x10xf32, #tpu.memory_space<vmem>>, vector<64x10xf32>
    tpu.vector_store %arg6[%c0_10, %c0_11], %12 {strides = array<i32>} : memref<64x10xf32, #tpu.memory_space<vmem>>, vector<64x10xf32>,
    return
  }
  func.func @transform_0(%arg0: i32) -> (i32, i32) {
    %c0_i32 = arith.constant 0 : i32
    %c0_i32_0 = arith.constant 0 : i32
    return %arg0, %c0_i32 : i32, i32
  }
  func.func @transform_1(%arg0: i32) -> (i32, i32) {
    %c0_i32 = arith.constant 0 : i32
    %c0_i32_0 = arith.constant 0 : i32
    %c0_i32_1 = arith.constant 0 : i32
    return %c0_i32, %c0_i32_0 : i32, i32
  }
  func.func @transform_2(%arg0: i32) -> (i32, i32) {
    %c0_i32 = arith.constant 0 : i32
    %c0_i32_0 = arith.constant 0 : i32
    %c0_i32_1 = arith.constant 0 : i32
    return %c0_i32, %c0_i32_0 : i32, i32
  }
  func.func @transform_3(%arg0: i32) -> (i32, i32) {
    %c0_i32 = arith.constant 0 : i32
    %c0_i32_0 = arith.constant 0 : i32
    %c0_i32_1 = arith.constant 0 : i32
    return %c0_i32, %c0_i32_0 : i32, i32
  }
  func.func @transform_4(%arg0: i32) -> (i32, i32) {
    %c0_i32 = arith.constant 0 : i32
    %c0_i32_0 = arith.constant 0 : i32
    %c0_i32_1 = arith.constant 0 : i32
    return %c0_i32, %c0_i32_0 : i32, i32
  }
  func.func @transform_5(%arg0: i32) -> (i32, i32) {
    %c0_i32 = arith.constant 0 : i32
    %c0_i32_0 = arith.constant 0 : i32
    return %arg0, %c0_i32 : i32, i32
  }
}

</mosaic_0001>

<bundles_post_ra>
// kernel: dynamicnet_forward.1
= control target key start
LH: loop header
LB: loop body
LE: loop exit
PB: predicated region body
PF: predicated region fallthrough
CT: control target
= control target key end

     0   :  { %10 = vsyncpa [#allocation3], 0  ;;  %s1609_s0 = inlined_call_operand.hbm [shape: f32[64,1000], index: 0, kind: input, shape index: {}]   ;;  %s1610_s1 = inlined_call_operand.hbm [shape: bf16[1000,128], index: 1, kind: input, shape index: {}]   ;;  %s1611_s2 = inlined_call_operand.vmem [shape: f32[1,128], index: 2, kind: input, shape index: {}]   ;;  %s1612_s3 = inlined_call_operand.vmem [shape: bf16[128,10], index: 3, kind: input, shape index: {}]   ;;  %s1613_s4 = inlined_call_operand.vmem [shape: f32[1,10], index: 4, kind: input, shape index: {}]   ;;  %s1614_s5 = inlined_call_operand.vmem [shape: f32[64,10], index: 5, kind: output, shape index: {}]  }
   0x1   :  { %s16_s20 = sshll.u32 %s1609_s0, 4  ;;  %s17_s20 = int_to_ptr.hbm [resolvable:$true] %s16_s20 }
   0x2   :  { %11 = vsyncpa [#allocation5], 0  ;;  %s1447_s21 = smov [#allocation2]   ;;  %s29_s25 = sshll.u32 %s1610_s1, 4  ;;  %s30_s25 = int_to_ptr.hbm [resolvable:$true] %s29_s25 }
   0x3   :  { %s18_s22 = sshll.u32 %s1447_s21, 4  ;;  %s1448_s26 = smov 1024   ;;  %s19_s22 = int_to_ptr.vmem [resolvable:$true] %s18_s22 }
   0x4   :  { %s1449_s27 = smov 64   ;;  %s1450_s28 = smov [#allocation4]  }
   0x5   :  { %24 = dma.hbm_to_vmem [thread:$0]  %s17_s20, 8192, %s19_s22, [#allocation3], %s1448_s26, %s1448_s26, %s1449_s27  }
   0x6   :  { %s31_s29 = sshll.u32 %s1450_s28, 4  ;;  %s1451_s30 = smov 4   ;;  %s32_s29 = int_to_ptr.vmem [resolvable:$true] %s31_s29 }
   0x7   :  { %37 = dma.hbm_to_vmem [thread:$0]  %s30_s25, 8000, %s32_s29, [#allocation5], %s1449_s27, %s1449_s27, %s1451_s30  }
   0x8   :  { %1443 = dma.done.wait [#allocation3], 8192  }
   0x9   :  { %1444 = vsyncadd [#allocation3], 4294959104 }
   0xa   :  { %1445 = dma.done.wait [#allocation5], 8000  }
   0xb   :  { %1446 = vsyncadd [#allocation5], 4294959296  ;;  %v1309_v0 = vld [vmem:[#allocation4 + $0x38] sm:$0xff]  ;;  %v1308_v1 = vld [vmem:[#allocation4 + $0x30] sm:$0xff]  ;;  %vm666_vm0 = vcmask 1043456   ;;  %vm653_vm1 = vcmask 850944  }
   0xc   :  { %1372 = vmatpush.bf16.msra.mxu1 %v1309_v0  ;;  %670 = vmatpush.bf16.msra.mxu0 %v1309_v0  ;;  %v1325_v2 = vld [vmem:[#allocation4 + $0xb8] sm:$0xff]  ;;  %v1324_v4 = vld [vmem:[#allocation4 + $0xb0] sm:$0xff]  ;;  %v1307_v6 = vld [vmem:[#allocation4 + $0x28] sm:$0xff]  ;;  %vm1003_vm2 = vcmask 80896  }
   0xd   :  { %v1333_v3 = vld [vmem:[#allocation4 + $0xf8] sm:$0xff]  ;;  %728 = vmatpush.bf16.msra.mxu2 %v1325_v2  ;;  %v1332_v5 = vld [vmem:[#allocation4 + $0xf0] sm:$0xff]  ;;  %v1323_v7 = vld [vmem:[#allocation4 + $0xa8] sm:$0xff] }
   0xe   :  { %757 = vmatpush.bf16.msra.mxu3 %v1333_v3  ;;  %v1331_v8 = vld [vmem:[#allocation4 + $0xe8] sm:$0xff]  ;;  %v1306_v9 = vld [vmem:[#allocation4 + $0x20] sm:$0xff]  ;;  %v1305_v12 = vld [vmem:[#allocation4 + $0x18] sm:$0xff] }
   0xf   :  { %v1322_v10 = vld [vmem:[#allocation4 + $0xa0] sm:$0xff]  ;;  %v1321_v13 = vld [vmem:[#allocation4 + $0x98] sm:$0xff]  ;;  %v1304_v15 = vld [vmem:[#allocation4 + $0x10] sm:$0xff] }
  0x10   :  { %1373 = vmatpush.bf16.msra.mxu1 %v1308_v1  ;;  %671 = vmatpush.bf16.msra.mxu0 %v1308_v1  ;;  %v1330_v11 = vld [vmem:[#allocation4 + $0xe0] sm:$0xff]  ;;  %v1329_v14 = vld [vmem:[#allocation4 + $0xd8] sm:$0xff]  ;;  %v1320_v16 = vld [vmem:[#allocation4 + $0x90] sm:$0xff] }
  0x11   :  { %729 = vmatpush.bf16.msra.mxu2 %v1324_v4  ;;  %v1328_v17 = vld [vmem:[#allocation4 + $0xd0] sm:$0xff]  ;;  %v1303_v18 = vld [vmem:[#allocation4 + $0x8] sm:$0xff]  ;;  %v1302_v21 = vld [vmem:[#allocation4] sm:$0xff] }
  0x12   :  { %758 = vmatpush.bf16.msra.mxu3 %v1332_v5  ;;  %v1319_v19 = vld [vmem:[#allocation4 + $0x88] sm:$0xff]  ;;  %v85_v22 = vld [vmem:[#allocation2 + $0x100] sm:$0xff]  ;;  %v1317_v26 = vld [vmem:[#allocation4 + $0x78] sm:$0xff] }
  0x13   :  { %v1327_v20 = vld [vmem:[#allocation4 + $0xc8] sm:$0xff]  ;;  %v93_v23 = vld [vmem:[#allocation2 + $0x140] sm:$0xff]  ;;  %v1341_v27 = vld [vmem:[#allocation4 + $0x138] sm:$0xff] }
  0x14   :  { %1374 = vmatpush.bf16.msra.mxu1 %v1307_v6  ;;  %672 = vmatpush.bf16.msra.mxu0 %v1307_v6  ;;  %v53_v24 = vld [vmem:[#allocation2] sm:$0xff]  ;;  %v273_v28 = vld [vmem:[#allocation4 + $0x1f0] sm:$0xf]  ;;  %v133_v33 = vpack.c.bf16 %v93_v23, %v85_v22  ;;  %v56_v36 = vld [vmem:[#allocation2 + $0x18] sm:$0xff] }
  0x15   :  { %730 = vmatpush.bf16.msra.mxu2 %v1323_v7  ;;  %v61_v25 = vld [vmem:[#allocation2 + $0x40] sm:$0xff]  ;;  %v55_v31 = vld [vmem:[#allocation2 + $0x10] sm:$0xff]  ;;  %v527_v32 = vunpack.c.l.b16 %v273_v28  ;;  %v64_v37 = vld [vmem:[#allocation2 + $0x58] sm:$0xff] }
  0x16   :  { %759 = vmatpush.bf16.msra.mxu3 %v1331_v8  ;;  %v1318_v29 = vld [vmem:[#allocation4 + $0x80] sm:$0xff]  ;;  %v117_v34 = vpack.c.bf16 %v61_v25, %v53_v24  ;;  %v63_v35 = vld [vmem:[#allocation2 + $0x50] sm:$0xff]  ;;  %v1357_v38 = vld [vmem:[#allocation4 + $0x1b8] sm:$0xff]  ;;  %v120_v43 = vpack.c.bf16 %v64_v37, %v56_v36 }
  0x17   :  { %v1326_v30 = vld [vmem:[#allocation4 + $0xc0] sm:$0xff]  ;;  %v590_v39 = vpack.c.b16 %v527_v32, %v527_v32  ;;  %v1316_v40 = vld [vmem:[#allocation4 + $0x70] sm:$0xff]  ;;  %v119_v42 = vpack.c.bf16 %v63_v35, %v55_v31  ;;  %v1315_v46 = vld [vmem:[#allocation4 + $0x68] sm:$0xff] }
  0x18   :  { %1375 = vmatpush.bf16.msra.mxu1 %v1306_v9  ;;  %673 = vmatpush.bf16.msra.mxu0 %v1306_v9  ;;  %v1340_v41 = vld [vmem:[#allocation4 + $0x130] sm:$0xff]  ;;  %v1339_v47 = vld [vmem:[#allocation4 + $0x128] sm:$0xff]  ;;  %v1314_v50 = vld [vmem:[#allocation4 + $0x60] sm:$0xff] }
  0x19   :  { %731 = vmatpush.bf16.msra.mxu2 %v1322_v10  ;;  %v668_v44 = vsel %vm666_vm0, %v590_v39, 0  ;;  %v1356_v45 = vld [vmem:[#allocation4 + $0x1b0] sm:$0xff]  ;;  %v1363_v48 = vld [vmem:[#allocation4 + $0x1e8] sm:$0xff]  ;;  %v1338_v51 = vld [vmem:[#allocation4 + $0x120] sm:$0xff] }
  0x1a   :  { %760 = vmatpush.bf16.msra.mxu3 %v1330_v11  ;;  %v1355_v49 = vld [vmem:[#allocation4 + $0x1a8] sm:$0xff]  ;;  %v101_v52 = vld [vmem:[#allocation2 + $0x180] sm:$0xff]  ;;  %v1313_v56 = vld [vmem:[#allocation4 + $0x58] sm:$0xff] }
  0x1b   :  { %v109_v53 = vld [vmem:[#allocation2 + $0x1c0] sm:$0xff]  ;;  %v1337_v57 = vld [vmem:[#allocation4 + $0x118] sm:$0xff]  ;;  %v71_v58 = vld [vmem:[#allocation2 + $0x90] sm:$0xff] }
  0x1c   :  { %1376 = vmatpush.bf16.msra.mxu1 %v1305_v12  ;;  %674 = vmatpush.bf16.msra.mxu0 %v1305_v12  ;;  %v69_v54 = vld [vmem:[#allocation2 + $0x80] sm:$0xff]  ;;  %v141_v59 = vpack.c.bf16 %v109_v53, %v101_v52  ;;  %v79_v61 = vld [vmem:[#allocation2 + $0xd0] sm:$0xff]  ;;  %v72_v62 = vld [vmem:[#allocation2 + $0x98] sm:$0xff] }
  0x1d   :  { %732 = vmatpush.bf16.msra.mxu2 %v1321_v13  ;;  %v77_v55 = vld [vmem:[#allocation2 + $0xc0] sm:$0xff]  ;;  %v80_v63 = vld [vmem:[#allocation2 + $0xd8] sm:$0xff]  ;;  %v1312_v0 = vld [vmem:[#allocation4 + $0x50] sm:$0xff]  ;;  %v127_v2 = vpack.c.bf16 %v79_v61, %v71_v58 }
  0x1e   :  { %761 = vmatpush.bf16.msra.mxu3 %v1329_v14  ;;  %v125_v60 = vpack.c.bf16 %v77_v55, %v69_v54  ;;  %v1336_v1 = vld [vmem:[#allocation4 + $0x110] sm:$0xff]  ;;  %v128_v3 = vpack.c.bf16 %v80_v63, %v72_v62  ;;  %v1362_v4 = vld [vmem:[#allocation4 + $0x1e0] sm:$0xff]  ;;  %v1311_v6 = vld [vmem:[#allocation4 + $0x48] sm:$0xff] }
  0x1f   :  { %v1354_v5 = vld [vmem:[#allocation4 + $0x1a0] sm:$0xff]  ;;  %v1335_v7 = vld [vmem:[#allocation4 + $0x108] sm:$0xff]  ;;  %v1361_v8 = vld [vmem:[#allocation4 + $0x1d8] sm:$0xff] }
  0x20   :  { %1377 = vmatpush.bf16.msra.mxu1 %v1304_v15  ;;  %675 = vmatpush.bf16.msra.mxu0 %v1304_v15  ;;  %v1353_v9 = vld [vmem:[#allocation4 + $0x198] sm:$0xff]  ;;  %v1310_v10 = vld [vmem:[#allocation4 + $0x40] sm:$0xff]  ;;  %v54_v13 = vld [vmem:[#allocation2 + $0x8] sm:$0xff] }
  0x21   :  { %733 = vmatpush.bf16.msra.mxu2 %v1320_v16  ;;  %v1334_v11 = vld [vmem:[#allocation4 + $0x100] sm:$0xff]  ;;  %v1349_v12 = vld [vmem:[#allocation4 + $0x178] sm:$0xff]  ;;  %v62_v14 = vld [vmem:[#allocation2 + $0x48] sm:$0xff] }
  0x22   :  { %762 = vmatpush.bf16.msra.mxu3 %v1328_v17  ;;  %v57_v15 = vld [vmem:[#allocation2 + $0x20] sm:$0xff]  ;;  %v1348_v17 = vld [vmem:[#allocation4 + $0x170] sm:$0xff]  ;;  %v88_v22 = vld [vmem:[#allocation2 + $0x118] sm:$0xff] }
  0x23   :  { %v65_v16 = vld [vmem:[#allocation2 + $0x60] sm:$0xff]  ;;  %v96_v23 = vld [vmem:[#allocation2 + $0x158] sm:$0xff]  ;;  %v1347_v24 = vld [vmem:[#allocation4 + $0x168] sm:$0xff] }
  0x24   :  { %1378 = vmatpush.bf16.msra.mxu1 %v1303_v18  ;;  %676 = vmatpush.bf16.msra.mxu0 %v1303_v18  ;;  %v118_v18 = vpack.c.bf16 %v62_v14, %v54_v13  ;;  %v1352_v28 = vld [vmem:[#allocation4 + $0x190] sm:$0xff]  ;;  %v1351_v31 = vld [vmem:[#allocation4 + $0x188] sm:$0xff]  ;;  %v1345_v32 = vld [vmem:[#allocation4 + $0x158] sm:$0xff] }
  0x25   :  { %734 = vmatpush.bf16.msra.mxu2 %v1319_v19  ;;  %v121_v19 = vpack.c.bf16 %v65_v16, %v57_v15  ;;  %v73_v35 = vld [vmem:[#allocation2 + $0xa0] sm:$0xff]  ;;  %v1344_v37 = vld [vmem:[#allocation4 + $0x150] sm:$0xff]  ;;  %v60_v58 = vld [vmem:[#allocation2 + $0x38] sm:$0xff] }
  0x26   :  { %763 = vmatpush.bf16.msra.mxu3 %v1327_v20  ;;  %v87_v20 = vld [vmem:[#allocation2 + $0x110] sm:$0xff]  ;;  %v81_v36 = vld [vmem:[#allocation2 + $0xe0] sm:$0xff]  ;;  %v102_v62 = vld [vmem:[#allocation2 + $0x188] sm:$0xff] }
  0x27   :  { %v129_v39 = vpack.c.bf16 %v81_v36, %v73_v35  ;;  %v89_v52 = vld [vmem:[#allocation2 + $0x120] sm:$0xff]  ;;  %v110_v63 = vld [vmem:[#allocation2 + $0x1c8] sm:$0xff]  ;;  %v91_v13 = vld [vmem:[#allocation2 + $0x130] sm:$0xff] }
  0x28   :  { %1379 = vmatpush.bf16.msra.mxu1 %v1302_v21  ;;  %677 = vmatpush.bf16.msra.mxu0 %v1302_v21  ;;  %v95_v21 = vld [vmem:[#allocation2 + $0x150] sm:$0xff]  ;;  %v97_v53 = vld [vmem:[#allocation2 + $0x160] sm:$0xff]  ;;  %v92_v15 = vld [vmem:[#allocation2 + $0x138] sm:$0xff] }
  0x29   :  { %735 = vmatpush.bf16.msra.mxu2 %v1318_v29  ;;  %v135_v25 = vpack.c.bf16 %v95_v21, %v87_v20  ;;  %v1346_v29 = vld [vmem:[#allocation4 + $0x160] sm:$0xff]  ;;  %v137_v55 = vpack.c.bf16 %v97_v53, %v89_v52  ;;  %v99_v14 = vld [vmem:[#allocation2 + $0x170] sm:$0xff]  ;;  %v100_v16 = vld [vmem:[#allocation2 + $0x178] sm:$0xff] }
  0x2a   :  { %764 = vmatpush.bf16.msra.mxu3 %v1326_v30  ;;  %v1359_v30 = vld [vmem:[#allocation4 + $0x1c8] sm:$0xff] }
  0x2b   :  { %688 = vmatmul.bf16.vlgmr.msra.gmra.mxu1 %v133_v33  ;;  %678 = vmatmul.bf16.vlgmr.msra.gmra.mxu0 %v117_v34  ;;  %v70_v33 = vld [vmem:[#allocation2 + $0x88] sm:$0xff] }
  0x2c   :  { %699 = vmatpush.bf16.msrb.mxu1 %v1317_v26  ;;  %786 = vmatpush.bf16.msrb.mxu0 %v1341_v27  ;;  %v136_v26 = vpack.c.bf16 %v96_v23, %v88_v22  ;;  %v1360_v27 = vld [vmem:[#allocation4 + $0x1d0] sm:$0xff]  ;;  %v78_v34 = vld [vmem:[#allocation2 + $0xc8] sm:$0xff] }
  0x2d   :  { %844 = vmatpush.bf16.msrb.mxu2 %v1357_v38  ;;  %765 = vmatmul.bf16.vlgmr.msra.gmra.mxu3 %v120_v43  ;;  %v126_v38 = vpack.c.bf16 %v78_v34, %v70_v33  ;;  %v112_v43 = vld [vmem:[#allocation2 + $0x1d8] sm:$0xff]  ;;  %v82_v20 = vld [vmem:[#allocation2 + $0xe8] sm:$0xff]  ;;  %v107_v22 = vld [vmem:[#allocation2 + $0x1b0] sm:$0xff] }
  0x2e   :  { %874 = vmatpush.bf16.msrb.mxu3 %v668_v44  ;;  %736 = vmatmul.bf16.vlgmr.msra.gmra.mxu2 %v119_v42  ;;  %v104_v42 = vld [vmem:[#allocation2 + $0x198] sm:$0xff]  ;;  %v115_v23 = vld [vmem:[#allocation2 + $0x1f0] sm:$0xff]  ;;  %v106_v35 = vld [vmem:[#allocation2 + $0x1a8] sm:$0xff] }
  0x2f   :  { %v114_v36 = vld [vmem:[#allocation2 + $0x1e8] sm:$0xff] }
  0x30   :  { %700 = vmatpush.bf16.msrb.mxu1 %v1316_v40  ;;  %787 = vmatpush.bf16.msrb.mxu0 %v1340_v41  ;;  %v103_v40 = vld [vmem:[#allocation2 + $0x190] sm:$0xff] }
  0x31   :  { %845 = vmatpush.bf16.msrb.mxu2 %v1356_v45  ;;  %v111_v41 = vld [vmem:[#allocation2 + $0x1d0] sm:$0xff]  ;;  %v1350_v45 = vld [vmem:[#allocation4 + $0x180] sm:$0xff] }
  0x32   :  { %875 = vmatpush.bf16.msrb.mxu3 %v1363_v48  ;;  %v143_v44 = vpack.c.bf16 %v111_v41, %v103_v40  ;;  %v1358_v48 = vld [vmem:[#allocation4 + $0x1c0] sm:$0xff] }
  0x34   :  { %701 = vmatpush.bf16.msrb.mxu1 %v1315_v46  ;;  %788 = vmatpush.bf16.msrb.mxu0 %v1339_v47  ;;  %v144_v46 = vpack.c.bf16 %v112_v43, %v104_v42  ;;  %v1343_v47 = vld [vmem:[#allocation4 + $0x148] sm:$0xff] }
  0x35   :  { %846 = vmatpush.bf16.msrb.mxu2 %v1355_v49  ;;  %v1342_v49 = vld [vmem:[#allocation4 + $0x140] sm:$0xff] }
  0x36   :  { %876 = vmatpush.bf16.msrb.mxu3 %v1362_v4  ;;  %v75_v4 = vld [vmem:[#allocation2 + $0xb0] sm:$0xff] }
  0x38   :  { %702 = vmatpush.bf16.msrb.mxu1 %v1314_v50  ;;  %789 = vmatpush.bf16.msrb.mxu0 %v1338_v51  ;;  %v86_v50 = vld [vmem:[#allocation2 + $0x108] sm:$0xff] }
  0x39   :  { %847 = vmatpush.bf16.msrb.mxu2 %v1354_v5  ;;  %v94_v51 = vld [vmem:[#allocation2 + $0x148] sm:$0xff]  ;;  %v83_v5 = vld [vmem:[#allocation2 + $0xf0] sm:$0xff] }
  0x3a   :  { %877 = vmatpush.bf16.msrb.mxu3 %v1361_v8  ;;  %v134_v54 = vpack.c.bf16 %v94_v51, %v86_v50  ;;  %v131_v8 = vpack.c.bf16 %v83_v5, %v75_v4  ;;  %v1368_v5 = vld [vmem:[%s1612_s3 + $0x20] sm:$0xff] }
  0x3b   :  { %693 = vmatmul.bf16.gmra.mxu1 %v141_v59  ;;  %683 = vmatmul.bf16.gmra.mxu0 %v125_v60  ;;  %v68_v59 = vld [vmem:[#allocation2 + $0x78] sm:$0xff] }
  0x3c   :  { %703 = vmatpush.bf16.msrb.mxu1 %v1313_v56  ;;  %790 = vmatpush.bf16.msrb.mxu0 %v1337_v57  ;;  %v59_v56 = vld [vmem:[#allocation2 + $0x30] sm:$0xff]  ;;  %v124_v61 = vpack.c.bf16 %v68_v59, %v60_v58 }
  0x3d   :  { %770 = vmatmul.bf16.gmra.mxu3 %v128_v3  ;;  %848 = vmatpush.bf16.msrb.mxu2 %v1353_v9  ;;  %v67_v57 = vld [vmem:[#allocation2 + $0x70] sm:$0xff] }
  0x3e   :  { %741 = vmatmul.bf16.gmra.mxu2 %v127_v2  ;;  %878 = vmatpush.bf16.msrb.mxu3 %v1360_v27  ;;  %v123_v60 = vpack.c.bf16 %v67_v57, %v59_v56  ;;  %v142_v2 = vpack.c.bf16 %v110_v63, %v102_v62 }
  0x40   :  { %704 = vmatpush.bf16.msrb.mxu1 %v1312_v0  ;;  %791 = vmatpush.bf16.msrb.mxu0 %v1336_v1  ;;  %v105_v0 = vld [vmem:[#allocation2 + $0x1a0] sm:$0xff] }
  0x41   :  { %849 = vmatpush.bf16.msrb.mxu2 %v1352_v28  ;;  %v113_v1 = vld [vmem:[#allocation2 + $0x1e0] sm:$0xff]  ;;  %v90_v28 = vld [vmem:[#allocation2 + $0x128] sm:$0xff] }
  0x42   :  { %879 = vmatpush.bf16.msrb.mxu3 %v1359_v30  ;;  %v145_v3 = vpack.c.bf16 %v113_v1, %v105_v0 }
  0x44   :  { %705 = vmatpush.bf16.msrb.mxu1 %v1311_v6  ;;  %792 = vmatpush.bf16.msrb.mxu0 %v1335_v7  ;;  %v76_v6 = vld [vmem:[#allocation2 + $0xb8] sm:$0xff] }
  0x45   :  { %850 = vmatpush.bf16.msrb.mxu2 %v1351_v31  ;;  %v84_v7 = vld [vmem:[#allocation2 + $0xf8] sm:$0xff] }
  0x46   :  { %880 = vmatpush.bf16.msrb.mxu3 %v1358_v48  ;;  %v132_v9 = vpack.c.bf16 %v84_v7, %v76_v6 }
  0x48   :  { %706 = vmatpush.bf16.msrb.mxu1 %v1310_v10  ;;  %793 = vmatpush.bf16.msrb.mxu0 %v1334_v11  ;;  %v58_v10 = vld [vmem:[#allocation2 + $0x28] sm:$0xff] }
  0x49   :  { %851 = vmatpush.bf16.msrb.mxu2 %v1350_v45  ;;  %v66_v11 = vld [vmem:[#allocation2 + $0x68] sm:$0xff]  ;;  %v1505_v45 = vld [vmem:[%s1611_s2] ss:$0 sm:$0xff] }
  0x4b   :  { %707 = vmatmul.bf16.vlgmr.msrb.gmra.mxu1 %v118_v18  ;;  %794 = vmatmul.bf16.vlgmr.msrb.gmra.mxu0 %v121_v19  ;;  %v140_v18 = vpack.c.bf16 %v100_v16, %v92_v15  ;;  %v74_v19 = vld [vmem:[#allocation2 + $0xa8] sm:$0xff] }
  0x4c   :  { %815 = vmatpush.bf16.msra.mxu1 %v1349_v12  ;;  %v122_v12 = vpack.c.bf16 %v66_v11, %v58_v10  ;;  %v130_v21 = vpack.c.bf16 %v82_v20, %v74_v19  ;;  %v1364_v20 = vld [vmem:[%s1612_s3] sm:$0xff] }
  0x4d   :  { %775 = vmatmul.bf16.gmra.mxu3 %v136_v26  ;;  %v147_v26 = vpack.c.bf16 %v115_v23, %v107_v22 }
  0x4e   :  { %746 = vmatmul.bf16.gmra.mxu2 %v135_v25  ;;  %v116_v25 = vld [vmem:[#allocation2 + $0x1f8] sm:$0xff] }
  0x50   :  { %816 = vmatpush.bf16.msra.mxu1 %v1348_v17  ;;  %v139_v17 = vpack.c.bf16 %v99_v14, %v91_v13  ;;  %v1366_v14 = vld [vmem:[%s1612_s3 + $0x10] sm:$0xff] }
  0x54   :  { %817 = vmatpush.bf16.msra.mxu1 %v1347_v24  ;;  %v108_v24 = vld [vmem:[#allocation2 + $0x1b8] sm:$0xff] }
  0x55   :  { %v148_v27 = vpack.c.bf16 %v116_v25, %v108_v24 }
  0x58   :  { %818 = vmatpush.bf16.msra.mxu1 %v1346_v29  ;;  %v98_v29 = vld [vmem:[#allocation2 + $0x168] sm:$0xff] }
  0x59   :  { %v138_v30 = vpack.c.bf16 %v98_v29, %v90_v28 }
  0x5b   :  { %712 = vmatmul.bf16.gmra.mxu1 %v126_v38  ;;  %799 = vmatmul.bf16.gmra.mxu0 %v129_v39 }
  0x5c   :  { %819 = vmatpush.bf16.msra.mxu1 %v1345_v32 }
  0x5d   :  { %780 = vmatmul.bf16.gmra.mxu3 %v144_v46 }
  0x5e   :  { %751 = vmatmul.bf16.gmra.mxu2 %v143_v44 }
  0x60   :  { %820 = vmatpush.bf16.msra.mxu1 %v1344_v37  ;;  %v146_v37 = vpack.c.bf16 %v114_v36, %v106_v35 }
  0x64   :  { %821 = vmatpush.bf16.msra.mxu1 %v1343_v47 }
  0x68   :  { %822 = vmatpush.bf16.msra.mxu1 %v1342_v49 }
  0x6b   :  { %717 = vmatmul.bf16.gmra.mxu1 %v134_v54  ;;  %804 = vmatmul.bf16.gmra.mxu0 %v137_v55  ;;  %v1371_v54 = vld [vmem:[%s1612_s3 + $0x38] sm:$0xff] }
  0x6c   :  { %974 = vmatpush.bf16.msra.mxu0 %v1371_v54  ;;  %1380 = vmatpush.bf16.msra.mxu2 %v1371_v54 }
  0x6d   :  { %1266 = vmatmul.msk.bf16.vlgmr.msrb.gmra.mxu3 %vm653_vm1, %v124_v61 }
  0x6e   :  { %852 = vmatmul.bf16.vlgmr.msrb.gmra.mxu2 %v123_v60  ;;  %v1370_v60 = vld [vmem:[%s1612_s3 + $0x30] sm:$0xff] }
  0x70   :  { %975 = vmatpush.bf16.msra.mxu0 %v1370_v60  ;;  %1381 = vmatpush.bf16.msra.mxu2 %v1370_v60 }
  0x7b   :  { %722 = vmatmul.bf16.gmra.mxu1 %v142_v2  ;;  %809 = vmatmul.bf16.gmra.mxu0 %v145_v3  ;;  %v1369_v2 = vld [vmem:[%s1612_s3 + $0x28] sm:$0xff] }
  0x7c   :  { %976 = vmatpush.bf16.msra.mxu0 %v1369_v2  ;;  %1382 = vmatpush.bf16.msra.mxu2 %v1369_v2 }
  0x7d   :  { %1267 = vmatmul.msk.bf16.gmra.mxu3 %vm653_vm1, %v132_v9  ;;  %v1367_v9 = vld [vmem:[%s1612_s3 + $0x18] sm:$0xff] }
  0x7e   :  { %857 = vmatmul.bf16.gmra.mxu2 %v131_v8 }
  0x80   :  { %977 = vmatpush.bf16.msra.mxu0 %v1368_v5  ;;  %1383 = vmatpush.bf16.msra.mxu2 %v1368_v5 }
  0x84   :  { %978 = vmatpush.bf16.msra.mxu0 %v1367_v9  ;;  %1384 = vmatpush.bf16.msra.mxu2 %v1367_v9 }
  0x88   :  { %979 = vmatpush.bf16.msra.mxu0 %v1366_v14  ;;  %1385 = vmatpush.bf16.msra.mxu2 %v1366_v14 }
  0x8b   :  { %823 = vmatmul.bf16.vlgmr.msra.gmra.mxu1 %v122_v12 }
  0x8d   :  { %1268 = vmatmul.msk.bf16.gmra.mxu3 %vm653_vm1, %v140_v18 }
  0x8e   :  { %862 = vmatmul.bf16.gmra.mxu2 %v139_v17  ;;  %v1365_v17 = vld [vmem:[%s1612_s3 + $0x8] sm:$0xff] }
  0x8f   :  { %980 = vmatpush.bf16.msra.mxu0 %v1365_v17  ;;  %1386 = vmatpush.bf16.msra.mxu2 %v1365_v17 }
  0x93   :  { %981 = vmatpush.bf16.msra.mxu0 %v1364_v20  ;;  %1387 = vmatpush.bf16.msra.mxu2 %v1364_v20 }
  0x9b   :  { %828 = vmatmul.bf16.gmra.mxu1 %v130_v21 }
  0x9d   :  { %1269 = vmatmul.msk.bf16.gmra.mxu3 %vm653_vm1, %v148_v27 }
  0x9e   :  { %867 = vmatmul.bf16.gmra.mxu2 %v147_v26 }
  0xa8   :  { %v689_v31 = vpop.f32.mrf.mxu1  ;;  %v679_v41 = vpop.f32.mrf.mxu0 }
  0xa9   :  { %v680_v46 = vadd.f32 %v1505_v45, %v679_v41  ;;  %v690_v6 = vadd.f32 %v1505_v45, %v689_v31 }
  0xab   :  { %833 = vmatmul.bf16.gmra.mxu1 %v138_v30 }
  0xb0   :  { %v1492_v32 = vpop.f32.mrf.mxu1  ;;  %v766_v34 = vpop.f32.mrf.mxu3 }
  0xb1   :  { %v737_v33 = vpop.f32.mrf.mxu2  ;;  %v681_v49 = vpop.f32.mrf.mxu0 }
  0xb2   :  { %v682_v29 = vadd.f32 %v1505_v45, %v681_v49 }
  0xb8   :  { %v1494_v38 = vpop.f32.mrf.mxu1  ;;  %v1498_v40 = vpop.f32.mrf.mxu3 }
  0xb9   :  { %v1496_v39 = vpop.f32.mrf.mxu2  ;;  %v684_v56 = vpop.f32.mrf.mxu0  ;;  %v695_v22 = vadd.f32 %v1505_v45, %v1494_v38 }
  0xba   :  { %v685_v58 = vadd.f32 %v1505_v45, %v684_v56 }
  0xbb   :  { %838 = vmatmul.bf16.gmra.mxu1 %v146_v37 }
  0xc0   :  { %v1500_v42 = vpop.f32.mrf.mxu1  ;;  %v771_v44 = vpop.f32.mrf.mxu3 }
  0xc1   :  { %v742_v43 = vpop.f32.mrf.mxu2  ;;  %v686_v13 = vpop.f32.mrf.mxu0 }
  0xc8   :  { %v708_v47 = vpop.f32.mrf.mxu1  ;;  %v1510_v52 = vpop.f32.mrf.mxu3 }
  0xc9   :  { %v709_v48 = vadd.f32 %v708_v47, %v680_v46  ;;  %v1508_v50 = vpop.f32.mrf.mxu2  ;;  %v795_v21 = vpop.f32.mrf.mxu0  ;;  %v687_v46 = vadd.f32 %v1505_v45, %v686_v13 }
  0xcb   :  { %v738_v51 = vadd.f32 %v737_v33, %v709_v48 }
  0xcd   :  { %v1512_v53 = vadd.f32 %v766_v34, %v738_v51 }
  0xcf   :  { %v796_v38 = vadd.f32 %v795_v21, %v1512_v53 }
  0xd0   :  { %v710_v55 = vpop.f32.mrf.mxu1  ;;  %v776_v59 = vpop.f32.mrf.mxu3 }
  0xd1   :  { %v747_v57 = vpop.f32.mrf.mxu2  ;;  %v797_v30 = vpop.f32.mrf.mxu0  ;;  %v711_v33 = vadd.f32 %v710_v55, %v682_v29 }
  0xd3   :  { %v740_v35 = vadd.f32 %v1496_v39, %v711_v33 }
  0xd8   :  { %v713_v61 = vpop.f32.mrf.mxu1  ;;  %v1528_v4 = vpop.f32.mrf.mxu3 }
  0xd9   :  { %v714_v62 = vadd.f32 %v713_v61, %v685_v58  ;;  %v1523_v1 = vpop.f32.mrf.mxu2  ;;  %v800_v41 = vpop.f32.mrf.mxu0 }
  0xdb   :  { %v743_v63 = vadd.f32 %v742_v43, %v714_v62  ;;  %v769_v43 = vadd.f32 %v1498_v40, %v740_v35 }
  0xdd   :  { %v1521_v0 = vadd.f32 %v771_v44, %v743_v63  ;;  %v798_v47 = vadd.f32 %v797_v30, %v769_v43 }
  0xdf   :  { %v801_v62 = vadd.f32 %v800_v41, %v1521_v0 }
  0xe0   :  { %v715_v3 = vpop.f32.mrf.mxu1  ;;  %v781_v11 = vpop.f32.mrf.mxu3 }
  0xe1   :  { %v752_v8 = vpop.f32.mrf.mxu2  ;;  %v716_v55 = vadd.f32 %v715_v3, %v687_v46  ;;  %v802_v58 = vpop.f32.mrf.mxu0  ;;  %v692_v3 = vadd.f32 %v1505_v45, %v1492_v32 }
  0xe3   :  { %v745_v60 = vadd.f32 %v1508_v50, %v716_v55 }
  0xe5   :  { %v774_v63 = vadd.f32 %v1510_v52, %v745_v60 }
  0xe8   :  { %v718_v7 = vpop.f32.mrf.mxu1  ;;  %v1547_v19 = vpop.f32.mrf.mxu3 }
  0xe9   :  { %v719_v10 = vadd.f32 %v718_v7, %v690_v6  ;;  %v1545_v18 = vpop.f32.mrf.mxu2  ;;  %v805_v6 = vpop.f32.mrf.mxu0  ;;  %v803_v7 = vadd.f32 %v802_v58, %v774_v63 }
  0xeb   :  { %v748_v12 = vadd.f32 %v747_v57, %v719_v10 }
  0xed   :  { %v1540_v15 = vadd.f32 %v776_v59, %v748_v12 }
  0xf0   :  { %v720_v16 = vpop.f32.mrf.mxu1  ;;  %v882_v28 = vpop.f32.mrf.mxu3 }
  0xf1   :  { %v853_v26 = vpop.f32.mrf.mxu2  ;;  %v807_v52 = vpop.f32.mrf.mxu0 }
  0xf8   :  { %v723_v23 = vpop.f32.mrf.mxu1  ;;  %v884_v37 = vpop.f32.mrf.mxu3 }
  0xf9   :  { %v724_v24 = vadd.f32 %v723_v23, %v695_v22  ;;  %v855_v34 = vpop.f32.mrf.mxu2  ;;  %v806_v22 = vadd.f32 %v805_v6, %v1540_v15  ;;  %v810_v33 = vpop.f32.mrf.mxu0 }
  0xfb   :  { %v753_v25 = vadd.f32 %v752_v8, %v724_v24 }
  0xfd   :  { %v1554_v27 = vadd.f32 %v781_v11, %v753_v25  ;;  %v721_v11 = vadd.f32 %v720_v16, %v692_v3 }
  0xff   :  { %v750_v0 = vadd.f32 %v1523_v1, %v721_v11  ;;  %v811_v43 = vadd.f32 %v810_v33, %v1554_v27 }
 0x100   :  { %v725_v31 = vpop.f32.mrf.mxu1  ;;  %v887_v56 = vpop.f32.mrf.mxu3 }
 0x101   :  { %v858_v51 = vpop.f32.mrf.mxu2  ;;  %v779_v23 = vadd.f32 %v1528_v4, %v750_v0  ;;  %v812_v46 = vpop.f32.mrf.mxu0 }
 0x103   :  { %v808_v25 = vadd.f32 %v807_v52, %v779_v23 }
 0x108   :  { %v824_v36 = vpop.f32.mrf.mxu1  ;;  %v889_v2 = vpop.f32.mrf.mxu3 }
 0x109   :  { %v825_v44 = vadd.f32 %v824_v36, %v796_v38  ;;  %v860_v40 = vpop.f32.mrf.mxu2 }
 0x10b   :  { %v854_v49 = vadd.f32 %v853_v26, %v825_v44 }
 0x10d   :  { %v883_v39 = vadd.f32 %v882_v28, %v854_v49  ;;  %v697_v28 = vadd.f32 %v1505_v45, %v1500_v42 }
 0x10f   :  { %v726_v1 = vadd.f32 %v725_v31, %v697_v28 }
 0x110   :  { %v826_v48 = vpop.f32.mrf.mxu1  ;;  %v892_v17 = vpop.f32.mrf.mxu3 }
 0x111   :  { %v827_v54 = vadd.f32 %v826_v48, %v798_v47  ;;  %v863_v12 = vpop.f32.mrf.mxu2 }
 0x113   :  { %v856_v57 = vadd.f32 %v855_v34, %v827_v54 }
 0x115   :  { %v885_v59 = vadd.f32 %v884_v37, %v856_v57  ;;  %v755_v37 = vadd.f32 %v1545_v18, %v726_v1  ;;  %v1394_v57 = vld [vmem:[%s1613_s4] ss:$0 sm:$0xff] }
 0x117   :  { %v902_v61 = vpack.c.bf16 %v885_v59, %v883_v39  ;;  %v784_v44 = vadd.f32 %v1547_v19, %v755_v37 }
 0x118   :  { %v829_v53 = vpop.f32.mrf.mxu1  ;;  %v894_v26 = vpop.f32.mrf.mxu3 }
 0x119   :  { %982 = vmatmul.bf16.vlgmr.msra.gmra.mxu0 %v902_v61  ;;  %v830_v5 = vadd.f32 %v829_v53, %v801_v62  ;;  %v865_v32 = vpop.f32.mrf.mxu2  ;;  %v813_v45 = vadd.f32 %v812_v46, %v784_v44 }
 0x11b   :  { %v859_v9 = vadd.f32 %v858_v51, %v830_v5 }
 0x11d   :  { %v888_v13 = vadd.f32 %v887_v56, %v859_v9 }
 0x120   :  { %v831_v8 = vpop.f32.mrf.mxu1  ;;  %v897_v38 = vpop.f32.mrf.mxu3 }
 0x121   :  { %v832_v10 = vadd.f32 %v831_v8, %v803_v7  ;;  %v868_v41 = vpop.f32.mrf.mxu2 }
 0x123   :  { %v861_v50 = vadd.f32 %v860_v40, %v832_v10 }
 0x125   :  { %v890_v14 = vadd.f32 %v889_v2, %v861_v50 }
 0x127   :  { %v903_v20 = vpack.c.bf16 %v890_v14, %v888_v13 }
 0x128   :  { %v834_v21 = vpop.f32.mrf.mxu1  ;;  %v899_v54 = vpop.f32.mrf.mxu3 }
 0x129   :  { %987 = vmatmul.bf16.gmra.mxu0 %v903_v20  ;;  %v835_v24 = vadd.f32 %v834_v21, %v806_v22  ;;  %v870_v51 = vpop.f32.mrf.mxu2 }
 0x12b   :  { %v864_v29 = vadd.f32 %v863_v12, %v835_v24 }
 0x12d   :  { %v893_v35 = vadd.f32 %v892_v17, %v864_v29 }
 0x130   :  { %v836_v16 = vpop.f32.mrf.mxu1 }
 0x131   :  { %v837_v30 = vadd.f32 %v836_v16, %v808_v25 }
 0x133   :  { %v866_v34 = vadd.f32 %v865_v32, %v837_v30 }
 0x135   :  { %v895_v36 = vadd.f32 %v894_v26, %v866_v34 }
 0x137   :  { %v904_v15 = vpack.c.bf16 %v895_v36, %v893_v35 }
 0x138   :  { %v839_v4 = vpop.f32.mrf.mxu1 }
 0x139   :  { %992 = vmatmul.bf16.gmra.mxu0 %v904_v15  ;;  %v840_v42 = vadd.f32 %v839_v4, %v811_v43 }
 0x13b   :  { %v869_v48 = vadd.f32 %v868_v41, %v840_v42 }
 0x13d   :  { %v898_v56 = vadd.f32 %v897_v38, %v869_v48 }
 0x140   :  { %v841_v47 = vpop.f32.mrf.mxu1 }
 0x141   :  { %v842_v31 = vadd.f32 %v841_v47, %v813_v45 }
 0x143   :  { %v871_v49 = vadd.f32 %v870_v51, %v842_v31 }
 0x145   :  { %v900_v18 = vadd.f32 %v899_v54, %v871_v49 }
 0x147   :  { %v905_v55 = vpack.c.bf16 %v900_v18, %v898_v56 }
 0x149   :  { %997 = vmatmul.bf16.vlgmr.msra.gmra.mxu2 %v905_v55 }
 0x196   :  { %v983_v27 = vpop.f32.mrf.mxu0 }
 0x197   :  { %v984_v19 = vadd.f32 %v1394_v57, %v983_v27 }
 0x199   :  { %1004 = vst.msk [vmem:[%s1614_s5] sm:$0xff] %vm1003_vm2, %v984_v19 }
 0x19e   :  { %v985_v58 = vpop.f32.mrf.mxu0 }
 0x19f   :  { %v986_v39 = vadd.f32 %v1394_v57, %v985_v58 }
 0x1a1   :  { %1005 = vst.msk [vmem:[%s1614_s5 + $0x8] sm:$0xff] %vm1003_vm2, %v986_v39 }
 0x1a6   :  { %v988_v59 = vpop.f32.mrf.mxu0 }
 0x1a7   :  { %v989_v60 = vadd.f32 %v1394_v57, %v988_v59 }
 0x1a9   :  { %1006 = vst.msk [vmem:[%s1614_s5 + $0x10] sm:$0xff] %vm1003_vm2, %v989_v60 }
 0x1ae   :  { %v990_v61 = vpop.f32.mrf.mxu0 }
 0x1af   :  { %v991_v53 = vadd.f32 %v1394_v57, %v990_v61 }
 0x1b1   :  { %1007 = vst.msk [vmem:[%s1614_s5 + $0x18] sm:$0xff] %vm1003_vm2, %v991_v53 }
 0x1b6   :  { %v993_v40 = vpop.f32.mrf.mxu0 }
 0x1b7   :  { %v994_v62 = vadd.f32 %v1394_v57, %v993_v40 }
 0x1b9   :  { %1008 = vst.msk [vmem:[%s1614_s5 + $0x20] sm:$0xff] %vm1003_vm2, %v994_v62 }
 0x1be   :  { %v995_v63 = vpop.f32.mrf.mxu0 }
 0x1bf   :  { %v996_v2 = vadd.f32 %v1394_v57, %v995_v63 }
 0x1c1   :  { %1009 = vst.msk [vmem:[%s1614_s5 + $0x28] sm:$0xff] %vm1003_vm2, %v996_v2 }
 0x1cc   :  { %v998_v5 = vpop.f32.mrf.mxu2 }
 0x1cd   :  { %v999_v6 = vadd.f32 %v1394_v57, %v998_v5 }
 0x1cf   :  { %1010 = vst.msk [vmem:[%s1614_s5 + $0x30] sm:$0xff] %vm1003_vm2, %v999_v6 }
 0x1d4   :  { %v1000_v7 = vpop.f32.mrf.mxu2 }
 0x1d5   :  { %v1001_v8 = vadd.f32 %v1394_v57, %v1000_v7 }
 0x1d7   :  { %1011 = vst.msk [vmem:[%s1614_s5 + $0x38] sm:$0xff] %vm1003_vm2, %v1001_v8 }
 0x1d8   :  { %1016 = vsyncpa [#allocation3], 1 }
 0x1d9   :  { %1017 = vsyncpa [#allocation5], 1 }

</bundles_post_ra>
